<compile_context>
chip_gen: v7x
topology: tpu7x:2x2x1
jax: 0.10.0
libtpu: 0.0.40
codegen_flags: <defaults>
</compile_context>

<pallas_src>
import functools

import jax
import jax.numpy as jnp
from jax import lax
from jax.experimental import pallas as pl
from jax.experimental.pallas import tpu as pltpu


# ---------------------------------------------------------------------------
# Kernel
# ---------------------------------------------------------------------------
def _linear_kernel(x_ref, w_ref, b_ref, o_ref, *, mxu_dtype):
    # x_ref: [TB, in_dim]   (HBM-native dtype; cast in-kernel for the MXU)
    # w_ref: [in_dim, TN]   (pre-transposed once at init -> MXU-canonical RHS)
    # b_ref: [1, TN]        (f32)
    # o_ref: [TB, TN]       (f32)
    x = x_ref[...]
    w = w_ref[...]
    if mxu_dtype is not None:
        x = x.astype(mxu_dtype)  # no-op if x is already stored in mxu_dtype
    acc = lax.dot_general(
        x, w,
        dimension_numbers=(((1,), (0,)), ((), ())),
        preferred_element_type=jnp.float32,
    )
    o_ref[...] = (acc + b_ref[...].astype(jnp.float32)).astype(o_ref.dtype)


# ---------------------------------------------------------------------------
# One-time parameter preparation (do NOT call per forward step)
# ---------------------------------------------------------------------------
def _round_up(x, m):
    return ((x + m - 1) // m) * m


def prepare_params(weight, bias, *, mxu_dtype=None):
    """weight: [n_class, in_dim] (native PyTorch layout), bias: [n_class].
    Returns (w_t [in_dim, n_out_padded], b2 [1, n_out_padded] f32, n_class).
    Padding / transpose / dtype cast happen exactly once, at init time."""
    n_class, in_dim = weight.shape
    n_out = _round_up(n_class, 128)  # lane-dense output stores
    if n_out != n_class:
        weight = jnp.pad(weight, ((0, n_out - n_class), (0, 0)))
        bias = jnp.pad(bias, ((0, n_out - n_class),))
    w_t = weight.T  # [in_dim, n_out] -> no in-kernel transpose work, ever
    if mxu_dtype is not None:
        w_t = w_t.astype(mxu_dtype)
    w_t = jnp.asarray(w_t)
    b2 = jnp.asarray(bias, dtype=jnp.float32).reshape(1, n_out)
    return w_t, b2, n_class


# ---------------------------------------------------------------------------
# Tile selection / VMEM accounting
# ---------------------------------------------------------------------------
def _vmem_budget_bytes():
    """Scoped-VMEM budget with headroom; adapts to v5e/v6e (128 MiB) vs v7x (64 MiB)."""
    try:
        phys = int(getattr(pltpu.get_tpu_info(), "vmem_capacity_bytes", 64 << 20))
    except Exception:
        phys = 64 << 20
    return min(int(phys * 0.75), 96 << 20)


def _pick_tiles(batch, in_dim, n_out, x_itemsize, w_itemsize, out_itemsize, budget):
    """Returns (tb, tn, vmem_limit_bytes). Accounts for the double-buffered
    weight/bias as well as the x/out tiles (every BlockSpec input is 2x buffered)."""
    # --- N (class) tiling: double-buffered weight tile must fit in <= half budget.
    w_col_bytes = 2 * in_dim * w_itemsize
    max_w_bytes = budget // 2
    if w_col_bytes * n_out <= max_w_bytes:
        tn = n_out                      # whole weight resident across the grid
    else:
        tn = max(256, (max_w_bytes // max(w_col_bytes, 1)) // 256 * 256)
        tn = min(tn, n_out)             # 256-wide tiles keep the MXU fully fed
    # --- batch tile from the remaining budget.
    sub = max(8, 32 // x_itemsize)      # sublane packing of the x HBM dtype
    resident = 2 * in_dim * tn * w_itemsize + 2 * tn * 4      # weight + f32 bias
    per_row = 2 * (in_dim * x_itemsize + tn * out_itemsize)   # x tile + out tile
    tb = max(sub, (budget - resident) // max(per_row, 1))
    tb = min(tb, 1024)                  # per-step overhead ~0.35us; >=512 is near roofline
    if tb >= 256:
        tb = (tb // 256) * 256          # M multiples of 256 for the 256-wide MXUs
    else:
        tb = max(sub, (tb // sub) * sub)
    tb = min(tb, _round_up(batch, sub))  # don't tile past the batch
    vmem_limit = resident + tb * per_row + (2 << 20)   # + headroom for internals
    return int(tb), int(tn), int(max(vmem_limit, 4 << 20))


# ---------------------------------------------------------------------------
# Forward pass (this is the only thing that should live inside jit)
# ---------------------------------------------------------------------------
def logistic_regression_forward(x, w_t, b2, *, n_class, mxu_dtype=None):
    """x: [B, in_dim] (f32, or bf16 if cast upstream); w_t/b2 from prepare_params."""
    B, in_dim = x.shape
    n_out = w_t.shape[1]
    out_dtype = jnp.float32

    tb, tn, vmem_bytes = _pick_tiles(
        B, in_dim, n_out,
        jnp.dtype(x.dtype).itemsize,
        jnp.dtype(w_t.dtype).itemsize,
        jnp.dtype(out_dtype).itemsize,
        _vmem_budget_bytes(),
    )
    nb = pl.cdiv(B, tb)       # ragged last batch tile handled by Pallas (OOB writes dropped)
    nj = pl.cdiv(n_out, tn)   # 1 unless the weight is too big to sit whole in VMEM

    flops = 2 * B * in_dim * n_out
    bytes_accessed = (
        x.size * jnp.dtype(x.dtype).itemsize
        + nb * w_t.size * jnp.dtype(w_t.dtype).itemsize  # weight re-read per batch tile if N-tiled
        + b2.size * 4
        + B * n_out * 4
    )

    kernel = functools.partial(_linear_kernel, mxu_dtype=mxu_dtype)

    out = pl.pallas_call(
        kernel,
        out_shape=jax.ShapeDtypeStruct((B, n_out), out_dtype),
        grid_spec=pl.GridSpec(
            grid=(nb, nj),
            in_specs=[
                # x streams tile-by-tile over the batch (double-buffered by BlockSpec).
                # If profiling shows exposed DMA here, sweep pipeline_mode=pl.Buffered(3).
                pl.BlockSpec((tb, in_dim), lambda i, j: (i, 0)),
                # Weight: fully VMEM-resident when nj == 1, else streamed 256-wide.
                pl.BlockSpec((in_dim, tn), lambda i, j: (0, j)),
                pl.BlockSpec((1, tn), lambda i, j: (0, j)),
            ],
            out_specs=pl.BlockSpec((tb, tn), lambda i, j: (i, j)),
        ),
        compiler_params=pltpu.CompilerParams(
            # Only load-bearing on v7x (2 TCs/chip); harmless on v5e/v6e.
            dimension_semantics=("parallel", "parallel"),
            vmem_limit_bytes=vmem_bytes,
        ),
        cost_estimate=pl.CostEstimate(
            flops=int(flops), transcendentals=0, bytes_accessed=int(bytes_accessed)
        ),
    )(x, w_t, b2)

    if n_class != n_out:
        out = out[:, :n_class]  # strip the zero-padded classes
    return out


# ---------------------------------------------------------------------------
if __name__ == "__main__":
    # Small shapes consistent with nn.Linear(in_dim, n_class)
    batch, in_dim, n_class = 8, 32, 16

    key = jax.random.PRNGKey(0)
    kx, kw, kb = jax.random.split(key, 3)

    # Deterministic init mirroring PyTorch nn.Linear default:
    # uniform(-1/sqrt(in_dim), 1/sqrt(in_dim))
    bound = 1.0 / (in_dim ** 0.5)
    x = jax.random.normal(kx, (batch, in_dim), dtype=jnp.float32)
    weight = jax.random.uniform(kw, (n_class, in_dim), dtype=jnp.float32,
                                minval=-bound, maxval=bound)
    bias = jax.random.uniform(kb, (n_class,), dtype=jnp.float32,
                              minval=-bound, maxval=bound)

    ref = x @ weight.T + bias

    # --- f32 MXU path (bit-faithful to the PyTorch module) -------------------
    w_t, b2, nc = prepare_params(weight, bias)          # one-time, outside jit
    fwd = jax.jit(functools.partial(logistic_regression_forward, n_class=nc))
    out = jax.block_until_ready(fwd(x, w_t, b2))
    assert out.shape == (batch, n_class)
    assert jnp.allclose(out, ref, atol=1e-5, rtol=1e-5), "f32 path mismatch"

    # --- bf16 MXU-input / f32-accumulate path --------------------------------
    # (weight cast once at init; x cast inside the kernel -> no extra HBM pass)
    w_t16, b216, nc16 = prepare_params(weight, bias, mxu_dtype=jnp.bfloat16)
    fwd16 = jax.jit(functools.partial(logistic_regression_forward,
                                      n_class=nc16, mxu_dtype=jnp.bfloat16))
    out16 = jax.block_until_ready(fwd16(x, w_t16, b216))
    assert jnp.allclose(out16, ref, atol=5e-2, rtol=5e-2), "bf16 path mismatch"

    print("KERNEL_OK")
</pallas_src>

<mosaic_0001>
module attributes {stable_mosaic.version = 11 : i64} {
  func.func @_linear_kernel(%arg0: i32, %arg1: i32, %arg2: memref<8x32xf32, #tpu.memory_space<vmem>>, %arg3: memref<32x128xf32, #tpu.memory_space<vmem>>, %arg4: memref<1x128xf32, #tpu.memory_space<vmem>>, %arg5: memref<8x128xf32, #tpu.memory_space<vmem>>) attributes {dimension_semantics = [#tpu.dimension_semantics<parallel>, #tpu.dimension_semantics<parallel>], iteration_bounds = array<i64: 1, 1>, scalar_prefetch = 0 : i64, scratch_operands = 0 : i64, tpu.core_type = #tpu.core_type<tc>, window_params = [{transform_indices = @transform_0, window_bounds = array<i64: 8, 32>}, {transform_indices = @transform_1, window_bounds = array<i64: 32, 128>}, {transform_indices = @transform_2, window_bounds = array<i64: 1, 128>}, {transform_indices = @transform_3, window_bounds = array<i64: 8, 128>}]} {
    %c0 = arith.constant 0 : index
    %c0_0 = arith.constant 0 : index
    %0 = vector.load %arg2[%c0, %c0_0] : memref<8x32xf32, #tpu.memory_space<vmem>>, vector<8x32xf32>
    %c0_1 = arith.constant 0 : index
    %c0_2 = arith.constant 0 : index
    %1 = vector.load %arg3[%c0_1, %c0_2] : memref<32x128xf32, #tpu.memory_space<vmem>>, vector<32x128xf32>
    %cst = arith.constant dense<0.000000e+00> : vector<8x128xf32>
    %2 = tpu.matmul %0, %1, %cst {dimension_numbers = #tpu.dot_dimension_numbers<[1], [0], [0], [1], [0, 0, 1, 1], [], []>} : vector<8x32xf32>, vector<32x128xf32>, vector<8x128xf32> -> vector<8x128xf32>
    %c0_3 = arith.constant 0 : index
    %c0_4 = arith.constant 0 : index
    %3 = vector.load %arg4[%c0_3, %c0_4] : memref<1x128xf32, #tpu.memory_space<vmem>>, vector<1x128xf32>
    %4 = vector.broadcast %3 : vector<1x128xf32> to vector<8x128xf32>
    %5 = arith.addf %2, %4 : vector<8x128xf32>
    %c0_5 = arith.constant 0 : index
    %c0_6 = arith.constant 0 : index
    %6 = vector.load %arg5[%c0_5, %c0_6] : memref<8x128xf32, #tpu.memory_space<vmem>>, vector<8x128xf32>
    tpu.vector_store %arg5[%c0_5, %c0_6], %5 {strides = array<i32>} : memref<8x128xf32, #tpu.memory_space<vmem>>, vector<8x128xf32>,
    return
  }
  func.func @transform_0(%arg0: i32, %arg1: i32) -> (i32, i32) {
    %c0_i32 = arith.constant 0 : i32
    %c0_i32_0 = arith.constant 0 : i32
    return %arg0, %c0_i32 : i32, i32
  }
  func.func @transform_1(%arg0: i32, %arg1: i32) -> (i32, i32) {
    %c0_i32 = arith.constant 0 : i32
    %c0_i32_0 = arith.constant 0 : i32
    return %c0_i32, %arg1 : i32, i32
  }
  func.func @transform_2(%arg0: i32, %arg1: i32) -> (i32, i32) {
    %c0_i32 = arith.constant 0 : i32
    %c0_i32_0 = arith.constant 0 : i32
    return %c0_i32, %arg1 : i32, i32
  }
  func.func @transform_3(%arg0: i32, %arg1: i32) -> (i32, i32) {
    %c0_i32 = arith.constant 0 : i32
    return %arg0, %arg1 : i32, i32
  }
}

</mosaic_0001>

<bundles_post_ra>
// kernel: logistic_regression_forward.1
= control target key start
LH: loop header
LB: loop body
LE: loop exit
PB: predicated region body
PF: predicated region fallthrough
CT: control target
= control target key end

     0   :  { %8 = vsyncpa [#allocation3], 0  ;;  %s322_s0 = inlined_call_operand.hbm [shape: f32[8,32], index: 0, kind: input, shape index: {}]   ;;  %s323_s1 = inlined_call_operand.hbm [shape: f32[32,128], index: 1, kind: input, shape index: {}]   ;;  %s324_s2 = inlined_call_operand.vmem [shape: f32[1,128], index: 2, kind: input, shape index: {}]   ;;  %s325_s3 = inlined_call_operand.hbm [shape: f32[8,128], index: 3, kind: output, shape index: {}]  }
   0x1   :  { %9 = vsyncpa [#allocation6], 0 }
   0x2   :  { %10 = vsyncpa [#allocation4], 0  ;;  %s248_s12 = smov [#allocation2]   ;;  %s249_s14 = smov [#allocation5]  }
   0x3   :  { %s17_s13 = sshll.u32 %s248_s12, 4  ;;  %s26_s15 = sshll.u32 %s249_s14, 4  ;;  %s18_s13 = int_to_ptr.vmem [resolvable:$true] %s17_s13  ;;  %s276_s15 = int_to_ptr.vmem [resolvable:$true] %s26_s15 }
   0x4   :  { %s176_s18 = scalar_lea.hbm %s322_s0, 128 }
   0x5   :  { %p177_p0 = scmp.ne.s32.totalorder %s322_s0, %s176_s18  ;;  %p180_p1 = scmp.lt.u32.totalorder %s176_s18, %s322_s0 }
   0x7   :  { %p182_p2 = pnand %p180_p1, %p177_p0 }
   0x9   :  { %185 = shalt.err (!%p182_p2)
}
   0xa   :  { %s186_s23 = scalar_lea.vmem %s18_s13, 128  ;;  %p191_p4 = scmp.lt.s32.totalorder %s18_s13, %s18_s13 }
   0xb   :  { %p187_p3 = scmp.ne.s32.totalorder %s18_s13, %s186_s23  ;;  %p192_p5 = scmp.lt.s32.totalorder %s186_s23, %s186_s23 }
   0xd   :  { %p193_p6 = por %p192_p5, %p191_p4 }
   0xf   :  { %p194_p7 = pnand %p193_p6, %p187_p3 }
  0x11   :  { %197 = shalt.err (!%p194_p7)
}
  0x12   :  { %20 = dma.hbm_to_vmem [thread:$0]  %s322_s0, 128, %s18_s13, [#allocation3]  }
  0x13   :  { %s198_s28 = scalar_lea.hbm %s323_s1, 512 }
  0x14   :  { %p199_p8 = scmp.ne.s32.totalorder %s323_s1, %s198_s28  ;;  %p202_p9 = scmp.lt.u32.totalorder %s198_s28, %s323_s1 }
  0x16   :  { %p204_p10 = pnand %p202_p9, %p199_p8 }
  0x18   :  { %207 = shalt.err (!%p204_p10)
}
  0x19   :  { %s208_s6 = scalar_lea.vmem %s276_s15, 512  ;;  %p213_p12 = scmp.lt.s32.totalorder %s276_s15, %s276_s15 }
  0x1a   :  { %p209_p11 = scmp.ne.s32.totalorder %s276_s15, %s208_s6  ;;  %p214_p13 = scmp.lt.s32.totalorder %s208_s6, %s208_s6 }
  0x1c   :  { %p215_p0 = por %p214_p13, %p213_p12 }
  0x1e   :  { %p216_p1 = pnand %p215_p0, %p209_p11 }
  0x20   :  { %219 = shalt.err (!%p216_p1)
}
  0x21   :  { %s250_s0 = smov 128   ;;  %s251_s7 = smov 8  }
  0x22   :  { %32 = dma.hbm_to_vmem [thread:$0]  %s323_s1, 512, %s276_s15, [#allocation6], %s250_s0, %s250_s0, %s251_s7  }
  0x23   :  { %242 = dma.done.wait [#allocation3], 128  }
  0x24   :  { %243 = vsyncadd [#allocation3], 4294967168 }
  0x25   :  { %244 = dma.done.wait [#allocation6], 512  }
  0x26   :  { %245 = vsyncadd [#allocation6], 4294966784  ;;  %v252_v0 = vmov 0.0|0.0   ;;  %vm253_vm0 = vmmov 0   ;;  %v254_v1 = vmov 0.0   ;;  %v42_v2 = vld [vmem:[#allocation5] sm:$0xff] }
  0x27   :  { %162 = vmatprep.subr.bf16.mxu0 %v252_v0  ;;  %159 = vmatprep.mubr.msk.f32.mxu0 %vm253_vm0, %v254_v1  ;;  %v43_v3 = vld [vmem:[#allocation5 + $0x8] sm:$0xff]  ;;  %v44_v4 = vld [vmem:[#allocation5 + $0x10] sm:$0xff]  ;;  %v45_v6 = vld [vmem:[#allocation5 + $0x18] sm:$0xff]  ;;  %vm53_vm1 = vcmask 261120   ;;  %s255_s11 = smov [#allocation7]  }
  0x28   :  { %v163_v5 = vpack.c.bf16 %v43_v3, %v42_v2  ;;  %v166_v7 = vpack.c.bf16 %v45_v6, %v44_v4  ;;  %v41_v8 = vld [vmem:[#allocation2] sm:$0xff]  ;;  %s134_s12 = sshll.u32 %s255_s11, 4  ;;  %s135_s12 = int_to_ptr.vmem [resolvable:$true] %s134_s12 }
  0x29   :  { %v144_v9 = vld [vmem:[%s324_s2] ss:$0 sm:$0xff]  ;;  %s220_s13 = scalar_lea.vmem %s135_s12, 128  ;;  %p225_p3 = scmp.lt.s32.totalorder %s135_s12, %s135_s12 }
  0x2a   :  { %164 = vmatpush3.bf16.msra.mxu0 %v163_v5  ;;  %p221_p2 = scmp.ne.s32.totalorder %s135_s12, %s220_s13  ;;  %p226_p4 = scmp.lt.s32.totalorder %s220_s13, %s220_s13 }
  0x2b   :  { %165 = vmatprep.subr.bf16.mxu0 %v252_v0 }
  0x2c   :  { %p227_p5 = por %p226_p4, %p225_p3 }
  0x2e   :  { %167 = vmatpush3.bf16.msra.mxu0 %v166_v7  ;;  %p228_p6 = pnand %p227_p5, %p221_p2 }
  0x31   :  { %160 = vmatmul.mubr.msk.f32.vlgmr.msra.gmra.mrb[0].mxu0 %vm53_vm1, %v41_v8 }
 0x104   :  { %v123_v10 = vpop.f32.mrb[0].mxu0 }
 0x105   :  { %v124_v11 = vadd.f32 %v144_v9, %v123_v10  ;;  %v161_v12 = vpop.f32.mrb[1].mxu0 }
 0x107   :  { %127 = vst [vmem:[#allocation7] sm:$0xff] %v124_v11 }
 0x108   :  { %231 = shalt.err (!%p228_p6)
}
 0x109   :  { %s232_s16 = scalar_lea.hbm %s325_s3, 128 }
 0x10a   :  { %p233_p7 = scmp.ne.s32.totalorder %s325_s3, %s232_s16  ;;  %p236_p8 = scmp.lt.u32.totalorder %s232_s16, %s325_s3 }
 0x10c   :  { %p238_p9 = pnand %p236_p8, %p233_p7 }
 0x10e   :  { %241 = shalt.err (!%p238_p9)
}
 0x10f   :  { %137 = dma.vmem_to_hbm [thread:$0]  %s135_s12, 128, %s325_s3, [#allocation4]  }
 0x110   :  { %246 = dma.done.wait [#allocation4], 128  }
 0x111   :  { %247 = vsyncadd [#allocation4], 4294967168 }
 0x112   :  { %141 = vsyncpa [#allocation3], 1 }
 0x113   :  { %142 = vsyncpa [#allocation6], 1 }
 0x114   :  { %143 = vsyncpa [#allocation4], 1 }

</bundles_post_ra>
